<compile_context>
chip_gen: v6e
topology: v6e:2x2x1
jax: 0.10.0
libtpu: 0.0.40
codegen_flags: <defaults>
</compile_context>

<pallas_src>
import jax
import jax.numpy as jnp
from jax.experimental import pallas as pl
from jax.experimental.pallas import tpu as pltpu

_LANE = 128
_TARGET_STEP_BYTES = 2 * 1024 * 1024      # aim for >= ~2 MiB of HBM traffic per grid step
_MAX_NB_UNROLL = 32                       # bound trace-time unroll of the in-kernel batch loop
_VPU_MAX_CIN = 4                          # VPU path only for truly tiny channel counts
_VPU_MAX_COUT = 8
_VPU_MAX_THW = 1024                       # bound live vregs on the VPU path
_W_SINGLE_BUFFER_BYTES = 8 * 1024 * 1024  # single-buffer the (resident) weight beyond this


def _cdiv(a, b):
    return -(-a // b)


def _round_up(x, m):
    return _cdiv(x, m) * m


def _vmem_capacity_bytes():
    try:
        return int(pltpu.get_tpu_info().vmem_capacity_bytes)
    except Exception:
        return 64 * 1024 * 1024           # v7x per-TC capacity (most conservative fallback)


def _lat_blk_kernel_mxu(x_ref, w_ref, b_ref, o_ref):
    """(C_out, C_in) @ (C_in, t_hw) per batch row on the MXU, f32 accumulate.

    x: (Nb, C_in, t_hw)  w: (C_out, C_in)  b: (C_out, 1)  o: (Nb, C_out, t_hw)
    """
    w = w_ref[...]
    bias = b_ref[...].astype(jnp.float32)
    for i in range(x_ref.shape[0]):                      # static unroll, Nb <= 32
        acc = jnp.dot(w, x_ref[i], preferred_element_type=jnp.float32,
                      precision=jax.lax.Precision.HIGHEST)
        o_ref[i] = (acc + bias).astype(o_ref.dtype)


def _lat_blk_kernel_vpu(x_ref, w_ref, b_ref, o_ref):
    """Tiny-channel path (C_in <= 4, C_out <= 8): broadcast FMAs on the VPU.

    t_hw is clamped to <= 1024 lanes so the (C_out, t_hw) f32 accumulator stays
    within a handful of vregs (no spill traffic fighting the store slot).
    """
    w = w_ref[...].astype(jnp.float32)                   # (C_out, C_in)
    bias = b_ref[...].astype(jnp.float32)                # (C_out, 1)
    c_in = x_ref.shape[1]
    for i in range(x_ref.shape[0]):                      # static unroll, Nb <= 32
        x = x_ref[i].astype(jnp.float32)                 # (C_in, t_hw)
        acc = w[:, 0:1] * x[0:1, :] + bias               # (C_out, t_hw)
        for c in range(1, c_in):
            acc = acc + w[:, c:c + 1] * x[c:c + 1, :]
        o_ref[i] = acc.astype(o_ref.dtype)


def _plan_blocks(n, hw, c_in, c_out, itemsize, use_vpu, w_copies):
    """Pick (Nb, t_hw, vmem_limit_bytes) from the actual hardware VMEM capacity."""
    capacity = _vmem_capacity_bytes()
    budget = int(0.35 * capacity)                        # tile-sizing budget
    w_bytes = w_copies * c_in * c_out * itemsize

    # Per spatial column (lane): double-buffered x + out blocks, plus f32
    # accumulator / cast temporaries that materialise inside the kernel.
    per_col = 2 * (c_in + c_out) * itemsize + (c_in + c_out) * 4
    cap = max(budget - w_bytes, 512 * 1024) // per_col // _LANE * _LANE
    cap = int(max(_LANE, cap))
    if use_vpu:
        cap = min(cap, _VPU_MAX_THW)
    t_hw = hw if hw <= cap else cap

    # Batch blocking: when the whole spatial extent fits in one block the
    # per-step HBM traffic can be tiny (e.g. 16x16 maps -> ~100 KiB); pull
    # several batch rows into the block so each grid step moves ~2 MiB.
    nb = 1
    if t_hw == hw:
        per_batch = max((c_in + c_out) * t_hw * itemsize, 1)
        want = _cdiv(_TARGET_STEP_BYTES, per_batch)
        fit = max(budget - w_bytes, 512 * 1024) // max(per_col * t_hw, 1)
        nb = int(max(1, min(n, _MAX_NB_UNROLL, want, fit)))

    # Give the grid >= 2 steps so both v7x TensorCores get work ("parallel"
    # megacore sharding); free on v5e / v6e.
    if _cdiv(n, nb) * _cdiv(hw, t_hw) < 2:
        if hw > _LANE:
            t_hw = _round_up(_cdiv(hw, 2), _LANE)        # split the spatial axis
        elif nb > 1:
            nb = _cdiv(nb, 2)                            # else split the batch axis

    # vmem_limit_bytes from the actual footprint, generous slack, capped below
    # the physical per-core capacity (128 MiB v5e/v6e, 64 MiB v7x).
    x_blk = nb * c_in * t_hw * itemsize
    o_blk = nb * c_out * t_hw * itemsize
    acc_f32 = (c_in + c_out) * t_hw * 4
    footprint = 2 * (x_blk + o_blk) + w_bytes + acc_f32 + c_out * 4
    vmem_limit = int(min(max(2 * footprint + (16 << 20), 32 << 20), 0.9 * capacity))
    return nb, t_hw, vmem_limit


def basic_lat_blk(x_nchw, weight, bias, *, compute_dtype=None):
    """1x1 conv (BasicLatBlk.forward) via a Pallas kernel, NCHW in / NCHW out.

    Args:
      x_nchw: (N, C_in, H, W)
      weight: (C_out, C_in, 1, 1)   (PyTorch Conv2d weight layout)
      bias:   (C_out,)
      compute_dtype: optional activation/weight I/O dtype (e.g. jnp.bfloat16).
        The kernel is HBM-bound so halving activation bytes is ~2x; accumulation
        and the bias add stay in f32 regardless. Default None keeps f32 semantics.
    Returns:
      (N, C_out, H, W) with x's dtype (or compute_dtype if given).
    """
    if compute_dtype is not None:
        x_nchw = x_nchw.astype(compute_dtype)
        weight = weight.astype(compute_dtype)

    N, C_in, H, W = x_nchw.shape
    C_out = weight.shape[0]
    HW = H * W

    # Free, contiguous reshapes -- no NCHW<->NHWC transposes, no padding copies.
    x3 = x_nchw.reshape(N, C_in, HW)                     # spatial on the lane axis
    w_mat = weight.reshape(C_out, C_in)
    b_mat = bias.reshape(C_out, 1)

    itemsize = jnp.dtype(x3.dtype).itemsize
    use_vpu = (C_in <= _VPU_MAX_CIN) and (C_out <= _VPU_MAX_COUT)
    kernel = _lat_blk_kernel_vpu if use_vpu else _lat_blk_kernel_mxu

    # The weight never changes across grid steps; for very large weights skip
    # double-buffering so the VMEM goes to bigger activation tiles instead.
    single_buffer_w = (C_out * C_in * itemsize) > _W_SINGLE_BUFFER_BYTES
    w_copies = 1 if single_buffer_w else 2

    nb, t_hw, vmem_limit = _plan_blocks(N, HW, C_in, C_out, itemsize, use_vpu, w_copies)
    grid = (_cdiv(N, nb), _cdiv(HW, t_hw))

    w_spec_kwargs = {}
    if single_buffer_w:
        w_spec_kwargs["pipeline_mode"] = pl.Buffered(1)

    out3 = pl.pallas_call(
        kernel,
        out_shape=jax.ShapeDtypeStruct((N, C_out, HW), x3.dtype),
        grid=grid,
        in_specs=[
            # Ragged trailing batch/spatial blocks read padded data; safe because
            # the contraction is per-column / per-batch-row (garbage stays in the
            # masked output region).
            pl.BlockSpec((nb, C_in, t_hw), lambda i, j: (i, 0, j)),     # x tile
            pl.BlockSpec((C_out, C_in), lambda i, j: (0, 0),
                         **w_spec_kwargs),                              # weight (resident)
            pl.BlockSpec((C_out, 1), lambda i, j: (0, 0)),              # bias (resident)
        ],
        out_specs=pl.BlockSpec((nb, C_out, t_hw), lambda i, j: (i, 0, j)),
        compiler_params=pltpu.CompilerParams(
            dimension_semantics=("parallel", "parallel"),
            vmem_limit_bytes=vmem_limit,
        ),
    )(x3, w_mat, b_mat)

    return out3.reshape(N, C_out, H, W)


if __name__ == "__main__":
    key = jax.random.PRNGKey(0)

    def run_case(n, c_in, c_out, h, w, tol):
        k1, k2, k3 = jax.random.split(jax.random.fold_in(key, c_in * 1000 + c_out), 3)
        x = jax.random.normal(k1, (n, c_in, h, w), dtype=jnp.float32)
        weight = jax.random.normal(k2, (c_out, c_in, 1, 1), dtype=jnp.float32) * 0.1
        bias = jax.random.normal(k3, (c_out,), dtype=jnp.float32) * 0.1

        y = jax.block_until_ready(basic_lat_blk(x, weight, bias))

        ref = (jnp.einsum("nchw,oc->nohw", x, weight.reshape(c_out, c_in),
                          precision=jax.lax.Precision.HIGHEST)
               + bias[None, :, None, None])
        assert y.shape == (n, c_out, h, w)
        err = float(jnp.max(jnp.abs(y - ref)))
        assert jnp.allclose(y, ref, atol=tol, rtol=tol), err

    # Tiny-channel case (VPU broadcast-FMA path, batch-blocked grid).
    run_case(2, 4, 4, 16, 16, 1e-5)
    # Module-default channel count (MXU path, HIGHEST precision, batch-blocked).
    run_case(2, 64, 64, 16, 16, 1e-5)
    # Non-square channel counts + ragged trailing spatial block.
    run_case(3, 64, 32, 24, 24, 1e-5)
    # Larger channels forcing Nb=2 over N=3 (ragged batch block) on the MXU path.
    run_case(3, 512, 512, 16, 16, 1e-4)

    print("KERNEL_OK")
</pallas_src>

<mosaic_0001>
module attributes {stable_mosaic.version = 11 : i64} {
  func.func @_lat_blk_kernel_vpu(%arg0: i32, %arg1: i32, %arg2: memref<2x4x128xf32, #tpu.memory_space<vmem>>, %arg3: memref<4x4xf32, #tpu.memory_space<vmem>>, %arg4: memref<4x1xf32, #tpu.memory_space<vmem>>, %arg5: memref<2x4x128xf32, #tpu.memory_space<vmem>>) attributes {dimension_semantics = [#tpu.dimension_semantics<parallel>, #tpu.dimension_semantics<parallel>], iteration_bounds = array<i64: 1, 2>, scalar_prefetch = 0 : i64, scratch_operands = 0 : i64, tpu.core_type = #tpu.core_type<tc>, window_params = [{transform_indices = @transform_0, window_bounds = array<i64: 2, 4, 128>}, {pipeline_mode = #tpu.pipeline_mode<synchronous>, transform_indices = @transform_1, window_bounds = array<i64: 4, 4>}, {pipeline_mode = #tpu.pipeline_mode<synchronous>, transform_indices = @transform_2, window_bounds = array<i64: 4, 1>}, {transform_indices = @transform_3, window_bounds = array<i64: 2, 4, 128>}]} {
    %c0 = arith.constant 0 : index
    %c0_0 = arith.constant 0 : index
    %0 = vector.load %arg3[%c0, %c0_0] : memref<4x4xf32, #tpu.memory_space<vmem>>, vector<4x4xf32>
    %c0_1 = arith.constant 0 : index
    %c0_2 = arith.constant 0 : index
    %1 = vector.load %arg4[%c0_1, %c0_2] : memref<4x1xf32, #tpu.memory_space<vmem>>, vector<4x1xf32>
    %c0_3 = arith.constant 0 : index
    %c0_4 = arith.constant 0 : index
    %c0_5 = arith.constant 0 : index
    %2 = vector.load %arg2[%c0_3, %c0_4, %c0_5] : memref<2x4x128xf32, #tpu.memory_space<vmem>>, vector<1x4x128xf32>
    %3 = vector.shape_cast %2 : vector<1x4x128xf32> to vector<4x128xf32>
    %4 = vector.extract_strided_slice %0 {offsets = [0, 0], sizes = [4, 1], strides = [1, 1]} : vector<4x4xf32> to vector<4x1xf32>
    %5 = vector.extract_strided_slice %3 {offsets = [0, 0], sizes = [1, 128], strides = [1, 1]} : vector<4x128xf32> to vector<1x128xf32>
    %6 = vector.broadcast %4 : vector<4x1xf32> to vector<4x128xf32>
    %7 = vector.broadcast %5 : vector<1x128xf32> to vector<4x128xf32>
    %8 = arith.mulf %6, %7 : vector<4x128xf32>
    %9 = vector.broadcast %1 : vector<4x1xf32> to vector<4x128xf32>
    %10 = arith.addf %8, %9 : vector<4x128xf32>
    %11 = vector.extract_strided_slice %0 {offsets = [0, 1], sizes = [4, 1], strides = [1, 1]} : vector<4x4xf32> to vector<4x1xf32>
    %12 = vector.extract_strided_slice %3 {offsets = [1, 0], sizes = [1, 128], strides = [1, 1]} : vector<4x128xf32> to vector<1x128xf32>
    %13 = vector.broadcast %11 : vector<4x1xf32> to vector<4x128xf32>
    %14 = vector.broadcast %12 : vector<1x128xf32> to vector<4x128xf32>
    %15 = arith.mulf %13, %14 : vector<4x128xf32>
    %16 = arith.addf %10, %15 : vector<4x128xf32>
    %17 = vector.extract_strided_slice %0 {offsets = [0, 2], sizes = [4, 1], strides = [1, 1]} : vector<4x4xf32> to vector<4x1xf32>
    %18 = vector.extract_strided_slice %3 {offsets = [2, 0], sizes = [1, 128], strides = [1, 1]} : vector<4x128xf32> to vector<1x128xf32>
    %19 = vector.broadcast %17 : vector<4x1xf32> to vector<4x128xf32>
    %20 = vector.broadcast %18 : vector<1x128xf32> to vector<4x128xf32>
    %21 = arith.mulf %19, %20 : vector<4x128xf32>
    %22 = arith.addf %16, %21 : vector<4x128xf32>
    %23 = vector.extract_strided_slice %0 {offsets = [0, 3], sizes = [4, 1], strides = [1, 1]} : vector<4x4xf32> to vector<4x1xf32>
    %24 = vector.extract_strided_slice %3 {offsets = [3, 0], sizes = [1, 128], strides = [1, 1]} : vector<4x128xf32> to vector<1x128xf32>
    %25 = vector.broadcast %23 : vector<4x1xf32> to vector<4x128xf32>
    %26 = vector.broadcast %24 : vector<1x128xf32> to vector<4x128xf32>
    %27 = arith.mulf %25, %26 : vector<4x128xf32>
    %28 = arith.addf %22, %27 : vector<4x128xf32>
    %c0_6 = arith.constant 0 : index
    %c0_7 = arith.constant 0 : index
    %c0_8 = arith.constant 0 : index
    %29 = vector.load %arg5[%c0_6, %c0_7, %c0_8] : memref<2x4x128xf32, #tpu.memory_space<vmem>>, vector<1x4x128xf32>
    %30 = vector.shape_cast %29 : vector<1x4x128xf32> to vector<4x128xf32>
    %31 = vector.shape_cast %28 : vector<4x128xf32> to vector<1x4x128xf32>
    tpu.vector_store %arg5[%c0_6, %c0_7, %c0_8], %31 {strides = array<i32>} : memref<2x4x128xf32, #tpu.memory_space<vmem>>, vector<1x4x128xf32>,
    %c1 = arith.constant 1 : index
    %c0_9 = arith.constant 0 : index
    %c0_10 = arith.constant 0 : index
    %32 = vector.load %arg2[%c1, %c0_9, %c0_10] : memref<2x4x128xf32, #tpu.memory_space<vmem>>, vector<1x4x128xf32>
    %33 = vector.shape_cast %32 : vector<1x4x128xf32> to vector<4x128xf32>
    %34 = vector.extract_strided_slice %0 {offsets = [0, 0], sizes = [4, 1], strides = [1, 1]} : vector<4x4xf32> to vector<4x1xf32>
    %35 = vector.extract_strided_slice %33 {offsets = [0, 0], sizes = [1, 128], strides = [1, 1]} : vector<4x128xf32> to vector<1x128xf32>
    %36 = vector.broadcast %34 : vector<4x1xf32> to vector<4x128xf32>
    %37 = vector.broadcast %35 : vector<1x128xf32> to vector<4x128xf32>
    %38 = arith.mulf %36, %37 : vector<4x128xf32>
    %39 = vector.broadcast %1 : vector<4x1xf32> to vector<4x128xf32>
    %40 = arith.addf %38, %39 : vector<4x128xf32>
    %41 = vector.extract_strided_slice %0 {offsets = [0, 1], sizes = [4, 1], strides = [1, 1]} : vector<4x4xf32> to vector<4x1xf32>
    %42 = vector.extract_strided_slice %33 {offsets = [1, 0], sizes = [1, 128], strides = [1, 1]} : vector<4x128xf32> to vector<1x128xf32>
    %43 = vector.broadcast %41 : vector<4x1xf32> to vector<4x128xf32>
    %44 = vector.broadcast %42 : vector<1x128xf32> to vector<4x128xf32>
    %45 = arith.mulf %43, %44 : vector<4x128xf32>
    %46 = arith.addf %40, %45 : vector<4x128xf32>
    %47 = vector.extract_strided_slice %0 {offsets = [0, 2], sizes = [4, 1], strides = [1, 1]} : vector<4x4xf32> to vector<4x1xf32>
    %48 = vector.extract_strided_slice %33 {offsets = [2, 0], sizes = [1, 128], strides = [1, 1]} : vector<4x128xf32> to vector<1x128xf32>
    %49 = vector.broadcast %47 : vector<4x1xf32> to vector<4x128xf32>
    %50 = vector.broadcast %48 : vector<1x128xf32> to vector<4x128xf32>
    %51 = arith.mulf %49, %50 : vector<4x128xf32>
    %52 = arith.addf %46, %51 : vector<4x128xf32>
    %53 = vector.extract_strided_slice %0 {offsets = [0, 3], sizes = [4, 1], strides = [1, 1]} : vector<4x4xf32> to vector<4x1xf32>
    %54 = vector.extract_strided_slice %33 {offsets = [3, 0], sizes = [1, 128], strides = [1, 1]} : vector<4x128xf32> to vector<1x128xf32>
    %55 = vector.broadcast %53 : vector<4x1xf32> to vector<4x128xf32>
    %56 = vector.broadcast %54 : vector<1x128xf32> to vector<4x128xf32>
    %57 = arith.mulf %55, %56 : vector<4x128xf32>
    %58 = arith.addf %52, %57 : vector<4x128xf32>
    %c1_11 = arith.constant 1 : index
    %c0_12 = arith.constant 0 : index
    %c0_13 = arith.constant 0 : index
    %59 = vector.load %arg5[%c1_11, %c0_12, %c0_13] : memref<2x4x128xf32, #tpu.memory_space<vmem>>, vector<1x4x128xf32>
    %60 = vector.shape_cast %59 : vector<1x4x128xf32> to vector<4x128xf32>
    %61 = vector.shape_cast %58 : vector<4x128xf32> to vector<1x4x128xf32>
    tpu.vector_store %arg5[%c1_11, %c0_12, %c0_13], %61 {strides = array<i32>} : memref<2x4x128xf32, #tpu.memory_space<vmem>>, vector<1x4x128xf32>,
    return
  }
  func.func @transform_0(%arg0: i32, %arg1: i32) -> (i32, i32, i32) {
    %c0_i32 = arith.constant 0 : i32
    %c0_i32_0 = arith.constant 0 : i32
    return %arg0, %c0_i32, %arg1 : i32, i32, i32
  }
  func.func @transform_1(%arg0: i32, %arg1: i32) -> (i32, i32) {
    %c0_i32 = arith.constant 0 : i32
    %c0_i32_0 = arith.constant 0 : i32
    %c0_i32_1 = arith.constant 0 : i32
    return %c0_i32, %c0_i32_0 : i32, i32
  }
  func.func @transform_2(%arg0: i32, %arg1: i32) -> (i32, i32) {
    %c0_i32 = arith.constant 0 : i32
    %c0_i32_0 = arith.constant 0 : i32
    %c0_i32_1 = arith.constant 0 : i32
    return %c0_i32, %c0_i32_0 : i32, i32
  }
  func.func @transform_3(%arg0: i32, %arg1: i32) -> (i32, i32, i32) {
    %c0_i32 = arith.constant 0 : i32
    %c0_i32_0 = arith.constant 0 : i32
    return %arg0, %c0_i32, %arg1 : i32, i32, i32
  }
}

</mosaic_0001>

<bundles_post_ra>
// kernel: tpu_custom_call.1
= control target key start
LH: loop header
LB: loop body
LE: loop exit
PB: predicated region body
PF: predicated region fallthrough
CT: control target
= control target key end

     0   :  { %8 = vsyncpa [#allocation3], 0  ;;  %s775_s0 = inlined_call_operand.hbm [shape: f32[2,4,256], index: 0, kind: input, shape index: {}]   ;;  %s776_s1 = inlined_call_operand.vmem [shape: f32[4,4], index: 1, kind: input, shape index: {}]   ;;  %s777_s2 = inlined_call_operand.vmem [shape: f32[4,1], index: 2, kind: input, shape index: {}]   ;;  %s778_s3 = inlined_call_operand.hbm [shape: f32[2,4,256], index: 3, kind: output, shape index: {}]  }
   0x1   :  { %10 = vsyncpa [#allocation3 + $0x1], 0 }
   0x2   :  { %11 = vsyncpa [#allocation4], 0 }
   0x3   :  { %13 = vsyncpa [#allocation4 + $0x1], 0  ;;  %s621_s12 = smov 0   ;;  %s623_s13 = smov 0  }
   0x4   :  { %s625_s14 = smov 0   ;;  %s627_s15 = smov 0  }
   0x5   :  { %s629_s16 = smov 0   ;;  %s631_s17 = smov 0  }
   0x6 LB: > { %s388_s18 = sadd.s32 4294967295, %s587_s17   ;;  %s389_s19 = sadd.s32 4294967294, %s587_s17   ;;  %s587_s17 = sphi %s631_s17, %s19_s17   ;;  %s583_s16 = sphi %s629_s16, %s789_s16   ;;  %s579_s15 = sphi %s627_s15, %s788_s15   ;;  %s575_s14 = sphi %s625_s14, %s787_s14   ;;  %s571_s13 = sphi %s623_s13, %s786_s13   ;;  %s567_s12 = sphi %s621_s12, %s785_s12  }
   0x7   : > { %s28_s20 = sadd.s32 1, %s583_s16  ;;  %s40_s21 = sadd.s32 1, %s575_s14 }
   0x8   : > { %p29_p0 = scmp.ge.s32.totalorder %s28_s20, 2  ;;  %p47_p1 = scmp.ne.s32.totalorder %s575_s14, %s571_s13 }
   0x9   : > { %p48_p2 = scmp.eq.s32.totalorder %s587_s17, 0  ;;  %p53_p3 = scmp.ne.s32.totalorder %s571_s13, %s567_s12 }
   0xa   : > { %s791_s20 = smov (%p29_p0, %s28_s20), 0  ;;  %p54_p5 = scmp.eq.s32.totalorder %s388_s18, 0 }
   0xb   : > { %p662_p4 = por %p48_p2, %p47_p1  ;;  %s36_s23 = ssub.s32 %s583_s16, %s791_s20 }
   0xc   : > { %p121_p6 = scmp.eq.s32.totalorder %s388_s18, 1  ;;  %p38_p7 = scmp.eq.s32.totalorder %s36_s23, 0 }
   0xd   : > { %p668_p8 = por %p54_p5, %p53_p3  ;;  %p127_p10 = scmp.eq.s32.totalorder %s389_s19, 1 }
   0xe   : > { %p672_p9 = por %p121_p6, %p47_p1  ;;  %p415_p13 = scmp.lt.s32.totalorder %s587_s17, 2 }
   0xf   : > { %s677_s26 = scalar_select %p38_p7, %s575_s14, %s40_s21  }
  0x10   : > { %p679_p11 = por %p127_p10, %p53_p3  ;;  %s153_s28 = sand.u32 1, %s575_s14  }
  0x11   : > { %s392_s29 = sshll.u32 %s153_s28, 3  ;;  %s393_s30 = sshll.u32 %s583_s16, 6 }
  0x12   : > { %s165_s6 = scalar_lea.hbm %s775_s0, %s393_s30  ;;  %s157_s7 = scalar_lea.vmem [#allocation2], %s392_s29 }
  0x13   : > { %s166_s8 = sshll.u32 %s157_s7, 4  ;;  %p692_p0 = pnand %p415_p13, %p662_p4  ;;  %s167_s8 = int_to_ptr.vmem [resolvable:$true] %s166_s8 }
  0x14   : > { %s154_s10 = scalar_lea.sflag [#allocation3], %s153_s28  ;;  %s492_s11 = scalar_lea.vmem %s167_s8, 128 }
  0x15   : > { %p481_p1 = pneg %p692_p0  ;;  %p493_p2 = scmp.ne.s32.totalorder %s167_s8, %s492_s11 }
  0x16   : > { %s589_s18 = smov [#allocation2]  }
  0x17   : > { %p495_p3 = pnand %p493_p2, %p481_p1  ;;  %s497_s19 = sshll.u32 %s589_s18, 4  ;;  %s498_s19 = int_to_ptr.vmem [resolvable:$false] %s497_s19 }
  0x18   : > { %s499_s21 = scalar_lea.vmem %s498_s19, 256  ;;  %p500_p6 = scmp.lt.s32.totalorder %s167_s8, %s498_s19 }
  0x19   : > { %p496_p5 = pneg %p495_p3  ;;  %p501_p7 = scmp.lt.s32.totalorder %s499_s21, %s492_s11 }
  0x1b   : > { %p502_p10 = por %p501_p7, %p500_p6 }
  0x1d   : > { %p503_p12 = pnand %p502_p10, %p496_p5 }
  0x1f   : > { %506 = shalt.err (!%p503_p12)
}
  0x20   : > { %s590_s22 = smov 128   ;;  %s591_s23 = smov 64  }
  0x21   : > { %s592_s28 = smov 4   ;;  %p394_p4 = scmp.ge.s32.totalorder %s587_s17, 1 }
  0x22   : > { %410 = dma.hbm_to_vmem [thread:$0]  (!%p692_p0), %s165_s6, 128, %s167_s8, %s154_s10, %s590_s22, %s591_s23, %s592_s28  }
  0x23   : > { %p174_p13 = scmp.lt.s32.totalorder %s587_s17, 3 }
  0x25   : > { %p175_p1 = pnand %p394_p4, %p174_p13 }
  0x26   : > { %s703_s29 = sand.u32 (!%p175_p1), 1, %s571_s13  }
  0x27   : > { %178 = sbr.rel (%p175_p1) target bundleno = 199 (0xc7), region = 32  ;;  %s395_s30 = sshll.u32 (!%p175_p1), %s703_s29, 3 }
  0x28   : > { %s181_s4 = scalar_lea.sflag (!%p175_p1), [#allocation3], %s703_s29  ;;  %s184_s5 = scalar_lea.vmem (!%p175_p1), [#allocation2], %s395_s30 }
  0x2c   : > { %558 = dma.done.wait (%p668_p8), %s181_s4, 128  }
  0x2d   : > { %560 = vsyncadd (%p668_p8), %s181_s4, 4294967168  ;;  %v593_v0 = vmov 0   ;;  %v594_v1 = vmov 1   ;;  %v209_v2 = vld [vmem:[%s776_s1] sm:$0xf]  ;;  %v595_v4 = vmov 2   ;;  %v217_v6 = vlaneseq }
  0x2e   : > { %475 = vset.pattern.permute.xlu0 %v593_v0  ;;  %476 = vset.pattern.permute.xlu1 %v594_v1  ;;  %v210_v3 = vld [vmem:[%s777_s2] sm:$0xf]  ;;  %v596_v5 = vmov 3   ;;  %v397_v10 = vld [vmem:[%s184_s5 + $0x4] sm:$0xf]  ;;  %s206_s24 = scalar_lea.vmem [#allocation5], %s395_s30 }
  0x2f   : > { %214 = vperm.xlu0 %475, %v209_v2   ;;  %229 = vperm.xlu1 %476, %v209_v2   ;;  %v218_v7 = vshrl.u32 %v217_v6, 7  ;;  %v211_v9 = vld [vmem:[%s184_s5] sm:$0xf]  ;;  %s303_s10 = sshll.u32 %s206_s24, 4  ;;  %s400_s11 = sshll.u32 %s579_s15, 6  ;;  %s722_s10 = int_to_ptr.vmem [resolvable:$true] %s303_s10 }
  0x30   : > { %s727_s21 = scalar_lea.hbm %s778_s3, %s400_s11  ;;  %s288_s15 = scalar_lea.sflag [#allocation4], %s703_s29 }
  0x31   : > { %v219_v8 = vsub.s32 0, %v218_v7  ;;  %v234_v11 = vsub.s32 1, %v218_v7  ;;  %v244_v12 = vsub.s32 2, %v218_v7  ;;  %v254_v21 = vsub.s32 3, %v218_v7  ;;  %s507_s22 = scalar_lea.vmem %s722_s10, 128  ;;  %s597_s23 = smov [#allocation5]  }
  0x32   : > { %p508_p8 = scmp.ne.s32.totalorder %s722_s10, %s507_s22  ;;  %s511_s28 = sshll.u32 %s597_s23, 4  ;;  %s512_s28 = int_to_ptr.vmem [resolvable:$false] %s511_s28 }
  0x33   : > { %224 = vperm.xlu0 %475, %v210_v3   ;;  %477 = vset.pattern.permute.xlu1 %v595_v4  ;;  %v220_v13 = vrot.slane %v211_v9, %v219_v8  ;;  %v264_v14 = vrot.slane %v397_v10, %v219_v8  ;;  %v235_v17 = vrot.slane %v211_v9, %v234_v11  ;;  %s513_s30 = scalar_lea.vmem %s512_s28, 256  ;;  %p514_p2 = scmp.lt.s32.totalorder %s722_s10, %s512_s28 }
  0x34   : > { %239 = vperm.xlu1 %477, %v209_v2   ;;  %v270_v18 = vrot.slane %v397_v10, %v234_v11  ;;  %v245_v19 = vrot.slane %v211_v9, %v244_v12  ;;  %v276_v20 = vrot.slane %v397_v10, %v244_v12  ;;  %v255_v32 = vrot.slane %v211_v9, %v254_v21  ;;  %p509_p12 = pnand %p508_p8, %p672_p9  ;;  %p515_p3 = scmp.lt.s32.totalorder %s513_s30, %s507_s22 }
  0x35   : > { %v282_v33 = vrot.slane %v397_v10, %v254_v21 }
  0x36   : > { %p510_p0 = pneg %p509_p12  ;;  %p516_p5 = por %p515_p3, %p514_p2 }
  0x37   : > { %478 = vset.pattern.permute.xlu0 %v596_v5 }
  0x38   : > { %249 = vperm.xlu0 %478, %v209_v2   ;;  %p517_p6 = pnand %p516_p5, %p510_p0 }
  0xaa   : > { %v215_v15 = vpop.permute.xlu0 %214  ;;  %v230_v16 = vpop.permute.xlu1 %229 }
  0xab   : > { %v221_v22 = vmul.f32 %v220_v13, %v215_v15  ;;  %v265_v23 = vmul.f32 %v264_v14, %v215_v15  ;;  %v236_v25 = vmul.f32 %v235_v17, %v230_v16  ;;  %v271_v26 = vmul.f32 %v270_v18, %v230_v16 }
  0xae   : > { %v225_v24 = vpop.permute.xlu0 %224 }
  0xaf   : > { %v227_v27 = vadd.f32 %v225_v24, %v221_v22  ;;  %v266_v28 = vadd.f32 %v265_v23, %v225_v24  ;;  %v240_v29 = vpop.permute.xlu1 %239 }
  0xb0   : > { %v246_v30 = vmul.f32 %v245_v19, %v240_v29  ;;  %v277_v31 = vmul.f32 %v276_v20, %v240_v29 }
  0xb1   : > { %v237_v34 = vadd.f32 %v236_v25, %v227_v27  ;;  %v272_v35 = vadd.f32 %v271_v26, %v266_v28 }
  0xb3   : > { %v247_v36 = vadd.f32 %v246_v30, %v237_v34  ;;  %v278_v37 = vadd.f32 %v277_v31, %v272_v35  ;;  %v250_v38 = vpop.permute.xlu0 %249 }
  0xb4   : > { %v256_v39 = vmul.f32 %v255_v32, %v250_v38  ;;  %v283_v40 = vmul.f32 %v282_v33, %v250_v38 }
  0xb6   : > { %v257_v41 = vadd.f32 %v256_v39, %v247_v36  ;;  %v284_v42 = vadd.f32 %v283_v40, %v278_v37 }
  0xb8   : > { %258 = vst [vmem:[%s206_s24] sm:$0xf] %v257_v41  ;;  %398 = vst [vmem:[%s206_s24 + $0x4] sm:$0xf] %v284_v42 }
  0xb9   : > { %520 = shalt.err (!%p517_p6)
}
  0xba   : > { %s521_s4 = scalar_lea.hbm %s727_s21, 128  ;;  %s525_s7 = scalar_lea.hbm %s778_s3, 256 }
  0xbb   : > { %p522_p7 = scmp.ne.s32.totalorder %s727_s21, %s521_s4  ;;  %p526_p13 = scmp.lt.s32.totalorder %s727_s21, %s778_s3 }
  0xbc   : > { %p527_p1 = scmp.lt.s32.totalorder %s525_s7, %s521_s4 }
  0xbd   : > { %p523_p10 = pnand %p522_p7, %p672_p9 }
  0xbe   : > { %p528_p8 = por %p527_p1, %p526_p13 }
  0xbf   : > { %p524_p4 = pneg %p523_p10 }
  0xc1   : > { %p529_p12 = pnand %p528_p8, %p524_p4 }
  0xc3   : > { %532 = shalt.err (!%p529_p12)
}
  0xc4   : > { %s598_s24 = smov 64   ;;  %s599_s11 = smov 128  }
  0xc5   : > { %s600_s18 = smov 4  }
  0xc6   : > { %405 = dma.vmem_to_hbm [thread:$0]  (%p672_p9), %s722_s10, 128, %s727_s21, %s288_s15, %s598_s24, %s599_s11, %s600_s18  }
  0xc7 PF: > { %s318_s19 = sand.u32 1, %s567_s12   ;;  %p784_p0 = scmp.ge.s32.totalorder %s587_s17, 2 }
  0xc8   : > { %s319_s22 = scalar_lea.sflag [#allocation4], %s318_s19 }
  0xc9   : > { %p412_p2 = pnand %p784_p0, %p679_p11 }
  0xcb   : > { %p413_p3 = pneg %p412_p2 }
  0xcd   : > { %562 = dma.done.wait (%p413_p3), %s319_s22, 128  }
  0xce   : > { %564 = vsyncadd (%p413_p3), %s319_s22, 4294967168  ;;  %s19_s17 = sadd.s32 1, %s587_s17   ;;  %s785_s12 = smov %s571_s13 }
  0xcf   : > { %p16_p5 = scmp.ge.s32.totalorder %s19_s17, 4   ;;  %s786_s13 = smov %s575_s14 }
  0xd0   : > { %s787_s14 = smov %s677_s26  ;;  %s788_s15 = smov %s583_s16 }
  0xd1   : > { %s789_s16 = smov %s791_s20  ;;  %18 = sbr.rel (!%p16_p5) target bundleno = 6 (0x6), region = 79 }
  0xd6   :  { %324 = vsyncpa [#allocation3], 1 }
  0xd7   :  { %326 = vsyncpa [#allocation3 + $0x1], 1 }
  0xd8   :  { %327 = vsyncpa [#allocation4], 1 }
  0xd9   :  { %329 = vsyncpa [#allocation4 + $0x1], 1 }

</bundles_post_ra>
